<compile_context>
chip_gen: v6e
topology: v6e:2x2x1
jax: 0.10.0
libtpu: 0.0.40
codegen_flags: <defaults>
</compile_context>

<pallas_src>
import jax
import jax.numpy as jnp
from jax import lax
from jax.experimental import pallas as pl
from jax.experimental.pallas import tpu as pltpu


# ----------------------------------------------------------------------------
# Pass 1: 1x1-Conv3d projections (hoisted out of the flash loop).
# ----------------------------------------------------------------------------
def _proj_kernel(x_ref, wq_ref, bq_ref, wk_ref, bk_ref, wv_ref, bv_ref,
                 q_ref, k_ref, v_ref):
    x = x_ref[0].astype(jnp.bfloat16)                          # (C, tn)

    def proj(w_ref, b_ref):
        y = lax.dot_general(w_ref[...], x,
                            dimension_numbers=(((1,), (0,)), ((), ())),
                            preferred_element_type=jnp.float32)
        return (y + b_ref[...]).astype(jnp.bfloat16)

    q_ref[0] = proj(wq_ref, bq_ref)                            # (Cq,  tn)
    k_ref[0] = proj(wk_ref, bk_ref)                            # (Cq,  tn)
    v_ref[0] = proj(wv_ref, bv_ref)                            # (C+8, tn); last 8 rows == 1


# ----------------------------------------------------------------------------
# Pass 2: flash attention (online softmax) + gamma-residual.
# ----------------------------------------------------------------------------
def _make_flash_kernel(C, use_bf16_exp):
    def kernel(gamma_ref, xq_ref, q_ref, k_ref, v_ref, o_ref, m_sc, acc_sc):
        ki = pl.program_id(2)
        nk = pl.num_programs(2)

        # ---- init (once per (batch, query-tile)).
        @pl.when(ki == 0)
        def _():
            m_sc[...] = jnp.full_like(m_sc[...], -jnp.inf)
            acc_sc[...] = jnp.zeros_like(acc_sc[...])

        # ---- scores s[j, i] = sum_c K[c, j] * Q[c, i] -> (tk, tq), lane = query.
        s = lax.dot_general(k_ref[0], q_ref[0],
                            dimension_numbers=(((0,), (0,)), ((), ())),
                            preferred_element_type=jnp.float32)

        # ---- online softmax over kv (axis 0), unnormalized accumulation.
        m_prev = m_sc[...]                                      # (1, tq)
        m_new = jnp.maximum(m_prev, jnp.max(s, axis=0, keepdims=True))
        alpha = jnp.exp(m_prev - m_new)                         # (1, tq)
        if use_bf16_exp:
            # bf16 exp (v6e/v7x): ~2x EUP throughput, MXU eats bf16 p anyway.
            p = jnp.exp((s - m_new).astype(jnp.bfloat16))       # (tk, tq) bf16
        else:
            # v5e has no bf16 EUP; keep the exp in f32 and cast for the MXU.
            p = jnp.exp(s - m_new).astype(jnp.bfloat16)

        # pv[:C] = V @ p ; pv[C:] = column sums of p (ones rows folded into V),
        # so the softmax denominator rides the MXU instead of the VPU/XLU.
        pv = lax.dot_general(v_ref[0], p,
                             dimension_numbers=(((1,), (0,)), ((), ())),
                             preferred_element_type=jnp.float32)  # (C+8, tq)
        acc_sc[...] = alpha * acc_sc[...] + pv
        m_sc[...] = m_new

        # ---- finalize: single approx reciprocal (EUP), residual, lane-dense store.
        @pl.when(ki == nk - 1)
        def _():
            acc = acc_sc[...]                                   # (C+8, tq)
            inv_l = pl.reciprocal(acc[C:C + 1, :], approx=True)  # (1, tq)
            out = acc[:C, :] * inv_l                            # (C, tq)
            o_ref[0] = (gamma_ref[0, 0] * out + xq_ref[0]).astype(o_ref.dtype)

    return kernel


# ----------------------------------------------------------------------------
# Chip-dependent configuration (VMEM budget, tile caps, exp dtype).
# ----------------------------------------------------------------------------
def _chip_config():
    kind = ""
    try:
        kind = jax.devices()[0].device_kind.lower()
    except Exception:
        pass
    try:
        vmem_cap = int(pltpu.get_tpu_info().vmem_capacity_bytes)
    except Exception:
        vmem_cap = (64 if ("v7" in kind or "7x" in kind) else 128) * 1024 * 1024

    is_v5 = "v5" in kind
    # Leave headroom for compiler temporaries and double buffers:
    # v7x (64 MiB) -> ~56 MiB, v5e/v6e (128 MiB) -> 100 MiB.
    vmem_limit = max(32 * 1024 * 1024,
                     min(vmem_cap - 8 * 1024 * 1024, 100 * 1024 * 1024))
    tile_cap = 1024 if vmem_cap <= 64 * 1024 * 1024 else 2048
    lane_multiple = 128 if is_v5 else 256   # 256-wide MXU on v6e/v7x
    return {
        "use_bf16_exp": not is_v5,
        "vmem_limit": int(vmem_limit),
        "tile_cap": int(tile_cap),
        "lane_multiple": lane_multiple,
    }


def _pick_tile(n, cap, multiple):
    """Largest divisor of n that is <= cap and a multiple of `multiple`
    (falling back to a multiple of 128, then the full extent)."""
    hi = min(cap, n)
    for t in range(hi, 0, -1):
        if n % t == 0 and t % multiple == 0:
            return t
    for t in range(hi, 0, -1):
        if n % t == 0 and t % 128 == 0:
            return t
    return n


# ----------------------------------------------------------------------------
# Wrapper.
# ----------------------------------------------------------------------------
def self_attention_3d(x_ncdhw, params, *, tq=None, tk=None):
    """x_ncdhw: (B, C, D, H, W) float32. Returns the same shape/dtype."""
    B, C, D, H, W = x_ncdhw.shape
    assert C >= 8, "in_channels must be >= 8 (C // 8 output channels)"
    N = D * H * W
    Cq = C // 8
    Ce = C + 8          # value rows + 8 sublane-aligned ones rows (MXU row-sums)

    cfg = _chip_config()
    cap, mult = cfg["tile_cap"], cfg["lane_multiple"]

    tq = _pick_tile(N, cap, mult) if tq is None else tq
    tk = _pick_tile(N, cap, mult) if tk is None else tk
    # v7x: make sure both TensorCores get work even at B == 1.
    if B * (N // tq) < 2 and N % 256 == 0:
        tq = N // 2
    assert N % tq == 0 and N % tk == 0
    n_q, n_k = N // tq, N // tk
    tn = tk             # projection-pass tile over N

    # Free reshape: NCDHW -> (B, C, N). No HBM transposes anywhere.
    x_bcn = x_ncdhw.reshape(B, C, N)

    # bf16 weights feed the MXU; accumulation stays f32 inside the kernels.
    wq = params["wq"].astype(jnp.bfloat16)                       # (Cq, C)
    wk = params["wk"].astype(jnp.bfloat16)                       # (Cq, C)
    # Pad Wv with 8 zero rows / bv with 8 one rows so V carries exact ones
    # rows -> the MXU computes the softmax denominator for free.
    wv = jnp.concatenate(
        [params["wv"], jnp.zeros((8, C), params["wv"].dtype)], axis=0
    ).astype(jnp.bfloat16)                                       # (C+8, C)
    bq, bk = params["bq"], params["bk"]                          # (Cq, 1) f32
    bv = jnp.concatenate(
        [params["bv"], jnp.ones((8, 1), params["bv"].dtype)], axis=0)  # (C+8, 1)
    gamma = params["gamma"]                                      # (1, 1) f32

    mosaic_proj = pltpu.CompilerParams(
        dimension_semantics=("parallel", "parallel"),
        vmem_limit_bytes=cfg["vmem_limit"])
    mosaic_flash = pltpu.CompilerParams(
        dimension_semantics=("parallel", "parallel", "arbitrary"),
        vmem_limit_bytes=cfg["vmem_limit"])

    # ---- Pass 1: projections -------------------------------------------------
    def const(shape):
        return pl.BlockSpec(shape, lambda b, t: tuple(0 for _ in shape))

    proj_cost = pl.CostEstimate(
        flops=int(B * 2 * N * C * (2 * Cq + Ce)),
        transcendentals=0,
        bytes_accessed=int(4 * B * C * N + 2 * B * N * (2 * Cq + Ce)
                           + 2 * (wq.size + wk.size + wv.size)
                           + 4 * (bq.size + bk.size + bv.size)))

    q_bf, k_bf, v_bf = pl.pallas_call(
        _proj_kernel,
        out_shape=(jax.ShapeDtypeStruct((B, Cq, N), jnp.bfloat16),
                   jax.ShapeDtypeStruct((B, Cq, N), jnp.bfloat16),
                   jax.ShapeDtypeStruct((B, Ce, N), jnp.bfloat16)),
        grid_spec=pltpu.PrefetchScalarGridSpec(
            num_scalar_prefetch=0,
            grid=(B, N // tn),
            in_specs=[
                pl.BlockSpec((1, C, tn), lambda b, t: (b, 0, t)),   # x tile
                const((Cq, C)), const((Cq, 1)),                     # Wq, bq
                const((Cq, C)), const((Cq, 1)),                     # Wk, bk
                const((Ce, C)), const((Ce, 1)),                     # Wv(+0 rows), bv(+1 rows)
            ],
            out_specs=[
                pl.BlockSpec((1, Cq, tn), lambda b, t: (b, 0, t)),
                pl.BlockSpec((1, Cq, tn), lambda b, t: (b, 0, t)),
                pl.BlockSpec((1, Ce, tn), lambda b, t: (b, 0, t)),
            ],
        ),
        compiler_params=mosaic_proj,
        cost_estimate=proj_cost,
    )(x_bcn, wq, bq, wk, bk, wv, bv)

    # ---- Pass 2: flash attention + residual ----------------------------------
    flash_cost = pl.CostEstimate(
        flops=int(B * 2 * N * N * (Cq + Ce)),
        transcendentals=int(B * N * N),
        bytes_accessed=int(4 * B * C * N                 # residual x read
                           + 2 * B * Cq * N              # Q read
                           + n_q * 2 * B * (Cq + Ce) * N  # K/V streamed per q tile
                           + 4 * B * C * N))             # output write

    out_bcn = pl.pallas_call(
        _make_flash_kernel(C, cfg["use_bf16_exp"]),
        out_shape=jax.ShapeDtypeStruct((B, C, N), x_bcn.dtype),
        grid_spec=pltpu.PrefetchScalarGridSpec(
            num_scalar_prefetch=0,
            grid=(B, n_q, n_k),
            in_specs=[
                pl.BlockSpec((1, 1), lambda b, qi, ki: (0, 0),
                             memory_space=pltpu.MemorySpace.SMEM),        # gamma
                pl.BlockSpec((1, C, tq), lambda b, qi, ki: (b, 0, qi)),    # x residual tile
                pl.BlockSpec((1, Cq, tq), lambda b, qi, ki: (b, 0, qi)),   # Q tile
                pl.BlockSpec((1, Cq, tk), lambda b, qi, ki: (b, 0, ki)),   # K tile (stream)
                pl.BlockSpec((1, Ce, tk), lambda b, qi, ki: (b, 0, ki)),   # V tile (stream)
            ],
            out_specs=pl.BlockSpec((1, C, tq), lambda b, qi, ki: (b, 0, qi)),
            scratch_shapes=[
                pltpu.VMEM((1, tq), jnp.float32),    # running max  m
                pltpu.VMEM((Ce, tq), jnp.float32),   # f32 accumulator (rows C..C+7 hold l)
            ],
        ),
        compiler_params=mosaic_flash,
        cost_estimate=flash_cost,
    )(gamma, x_bcn, q_bf, k_bf, v_bf)

    return out_bcn.reshape(B, C, D, H, W)


# ----------------------------------------------------------------------------
# Pure-JAX reference + params.
# ----------------------------------------------------------------------------
def _reference(x_ncdhw, params):
    B, C, D, H, W = x_ncdhw.shape
    N = D * H * W
    x = x_ncdhw.reshape(B, C, N)
    q = jnp.einsum("oc,bcn->bon", params["wq"], x) + params["bq"][None]
    k = jnp.einsum("oc,bcn->bon", params["wk"], x) + params["bk"][None]
    v = jnp.einsum("oc,bcn->bon", params["wv"], x) + params["bv"][None]
    att = jax.nn.softmax(jnp.einsum("bci,bcj->bij", q, k), axis=-1)   # (B, N, N)
    out = jnp.einsum("bij,bcj->bci", att, v)                          # (B, C, N)
    y = params["gamma"][0, 0] * out + x
    return y.reshape(B, C, D, H, W)


def init_params(key, C):
    Cq = C // 8
    ks = jax.random.split(key, 6)
    s = 0.1
    return {
        # Conv3d 1x1 weights kept in their native (out_ch, in_ch) layout.
        "wq": s * jax.random.normal(ks[0], (Cq, C), jnp.float32),
        "bq": s * jax.random.normal(ks[1], (Cq, 1), jnp.float32),
        "wk": s * jax.random.normal(ks[2], (Cq, C), jnp.float32),
        "bk": s * jax.random.normal(ks[3], (Cq, 1), jnp.float32),
        "wv": s * jax.random.normal(ks[4], (C, C), jnp.float32),
        "bv": s * jax.random.normal(ks[5], (C, 1), jnp.float32),
        # PyTorch inits gamma to 0 (output == x); use a nonzero value so the
        # attention path is actually exercised by the self-test.
        "gamma": jnp.full((1, 1), 0.5, jnp.float32),
    }


if __name__ == "__main__":
    key = jax.random.PRNGKey(0)
    B, C, D, H, W = 2, 16, 4, 4, 4          # Cq = 2, N = 64
    kx, kp = jax.random.split(key)
    x = jax.random.normal(kx, (B, C, D, H, W), jnp.float32)
    params = init_params(kp, C)

    y = jax.block_until_ready(self_attention_3d(x, params))
    y_ref = _reference(x, params)

    assert y.shape == x.shape and y.dtype == x.dtype
    err = jnp.max(jnp.abs(y - y_ref))
    scale = jnp.max(jnp.abs(y_ref))
    # bf16 MXU/exp inputs (f32 accumulation) -> loosened tolerance vs f32 ref.
    assert err <= 3e-2 * scale + 3e-2, f"mismatch vs reference: {err}"
    print("KERNEL_OK")
</pallas_src>

<mosaic_0001>
module attributes {stable_mosaic.version = 11 : i64} {
  func.func @_proj_kernel(%arg0: i32, %arg1: i32, %arg2: memref<1x16x64xf32, #tpu.memory_space<vmem>>, %arg3: memref<2x16xbf16, #tpu.memory_space<vmem>>, %arg4: memref<2x1xf32, #tpu.memory_space<vmem>>, %arg5: memref<2x16xbf16, #tpu.memory_space<vmem>>, %arg6: memref<2x1xf32, #tpu.memory_space<vmem>>, %arg7: memref<24x16xbf16, #tpu.memory_space<vmem>>, %arg8: memref<24x1xf32, #tpu.memory_space<vmem>>, %arg9: memref<1x2x64xbf16, #tpu.memory_space<vmem>>, %arg10: memref<1x2x64xbf16, #tpu.memory_space<vmem>>, %arg11: memref<1x24x64xbf16, #tpu.memory_space<vmem>>) attributes {dimension_semantics = [#tpu.dimension_semantics<parallel>, #tpu.dimension_semantics<parallel>], iteration_bounds = array<i64: 2, 1>, scalar_prefetch = 0 : i64, scratch_operands = 0 : i64, tpu.core_type = #tpu.core_type<tc>, window_params = [{transform_indices = @transform_0, window_bounds = array<i64: 1, 16, 64>}, {pipeline_mode = #tpu.pipeline_mode<synchronous>, transform_indices = @transform_1, window_bounds = array<i64: 2, 16>}, {pipeline_mode = #tpu.pipeline_mode<synchronous>, transform_indices = @transform_2, window_bounds = array<i64: 2, 1>}, {pipeline_mode = #tpu.pipeline_mode<synchronous>, transform_indices = @transform_3, window_bounds = array<i64: 2, 16>}, {pipeline_mode = #tpu.pipeline_mode<synchronous>, transform_indices = @transform_4, window_bounds = array<i64: 2, 1>}, {pipeline_mode = #tpu.pipeline_mode<synchronous>, transform_indices = @transform_5, window_bounds = array<i64: 24, 16>}, {pipeline_mode = #tpu.pipeline_mode<synchronous>, transform_indices = @transform_6, window_bounds = array<i64: 24, 1>}, {transform_indices = @transform_7, window_bounds = array<i64: 1, 2, 64>}, {transform_indices = @transform_8, window_bounds = array<i64: 1, 2, 64>}, {transform_indices = @transform_9, window_bounds = array<i64: 1, 24, 64>}]} {
    %c0 = arith.constant 0 : index
    %c0_0 = arith.constant 0 : index
    %c0_1 = arith.constant 0 : index
    %0 = vector.load %arg2[%c0, %c0_0, %c0_1] : memref<1x16x64xf32, #tpu.memory_space<vmem>>, vector<1x16x64xf32>
    %1 = vector.shape_cast %0 : vector<1x16x64xf32> to vector<16x64xf32>
    %2 = arith.truncf %1 : vector<16x64xf32> to vector<16x64xbf16>
    %c0_2 = arith.constant 0 : index
    %c0_3 = arith.constant 0 : index
    %3 = vector.load %arg3[%c0_2, %c0_3] : memref<2x16xbf16, #tpu.memory_space<vmem>>, vector<2x16xbf16>
    %cst = arith.constant dense<0.000000e+00> : vector<2x64xf32>
    %4 = tpu.matmul %3, %2, %cst {dimension_numbers = #tpu.dot_dimension_numbers<[1], [0], [0], [1], [0, 0, 1, 1], [], []>} : vector<2x16xbf16>, vector<16x64xbf16>, vector<2x64xf32> -> vector<2x64xf32>
    %c0_4 = arith.constant 0 : index
    %c0_5 = arith.constant 0 : index
    %5 = vector.load %arg4[%c0_4, %c0_5] : memref<2x1xf32, #tpu.memory_space<vmem>>, vector<2x1xf32>
    %6 = vector.broadcast %5 : vector<2x1xf32> to vector<2x64xf32>
    %7 = arith.addf %4, %6 : vector<2x64xf32>
    %8 = arith.truncf %7 : vector<2x64xf32> to vector<2x64xbf16>
    %c0_6 = arith.constant 0 : index
    %c0_7 = arith.constant 0 : index
    %c0_8 = arith.constant 0 : index
    %9 = vector.load %arg9[%c0_6, %c0_7, %c0_8] : memref<1x2x64xbf16, #tpu.memory_space<vmem>>, vector<1x2x64xbf16>
    %10 = vector.shape_cast %9 : vector<1x2x64xbf16> to vector<2x64xbf16>
    %11 = vector.shape_cast %8 : vector<2x64xbf16> to vector<1x2x64xbf16>
    tpu.vector_store %arg9[%c0_6, %c0_7, %c0_8], %11 {strides = array<i32>} : memref<1x2x64xbf16, #tpu.memory_space<vmem>>, vector<1x2x64xbf16>,
    %c0_9 = arith.constant 0 : index
    %c0_10 = arith.constant 0 : index
    %12 = vector.load %arg5[%c0_9, %c0_10] : memref<2x16xbf16, #tpu.memory_space<vmem>>, vector<2x16xbf16>
    %cst_11 = arith.constant dense<0.000000e+00> : vector<2x64xf32>
    %13 = tpu.matmul %12, %2, %cst_11 {dimension_numbers = #tpu.dot_dimension_numbers<[1], [0], [0], [1], [0, 0, 1, 1], [], []>} : vector<2x16xbf16>, vector<16x64xbf16>, vector<2x64xf32> -> vector<2x64xf32>
    %c0_12 = arith.constant 0 : index
    %c0_13 = arith.constant 0 : index
    %14 = vector.load %arg6[%c0_12, %c0_13] : memref<2x1xf32, #tpu.memory_space<vmem>>, vector<2x1xf32>
    %15 = vector.broadcast %14 : vector<2x1xf32> to vector<2x64xf32>
    %16 = arith.addf %13, %15 : vector<2x64xf32>
    %17 = arith.truncf %16 : vector<2x64xf32> to vector<2x64xbf16>
    %c0_14 = arith.constant 0 : index
    %c0_15 = arith.constant 0 : index
    %c0_16 = arith.constant 0 : index
    %18 = vector.load %arg10[%c0_14, %c0_15, %c0_16] : memref<1x2x64xbf16, #tpu.memory_space<vmem>>, vector<1x2x64xbf16>
    %19 = vector.shape_cast %18 : vector<1x2x64xbf16> to vector<2x64xbf16>
    %20 = vector.shape_cast %17 : vector<2x64xbf16> to vector<1x2x64xbf16>
    tpu.vector_store %arg10[%c0_14, %c0_15, %c0_16], %20 {strides = array<i32>} : memref<1x2x64xbf16, #tpu.memory_space<vmem>>, vector<1x2x64xbf16>,
    %c0_17 = arith.constant 0 : index
    %c0_18 = arith.constant 0 : index
    %21 = vector.load %arg7[%c0_17, %c0_18] : memref<24x16xbf16, #tpu.memory_space<vmem>>, vector<24x16xbf16>
    %cst_19 = arith.constant dense<0.000000e+00> : vector<24x64xf32>
    %22 = tpu.matmul %21, %2, %cst_19 {dimension_numbers = #tpu.dot_dimension_numbers<[1], [0], [0], [1], [0, 0, 1, 1], [], []>} : vector<24x16xbf16>, vector<16x64xbf16>, vector<24x64xf32> -> vector<24x64xf32>
    %c0_20 = arith.constant 0 : index
    %c0_21 = arith.constant 0 : index
    %23 = vector.load %arg8[%c0_20, %c0_21] : memref<24x1xf32, #tpu.memory_space<vmem>>, vector<24x1xf32>
    %24 = vector.broadcast %23 : vector<24x1xf32> to vector<24x64xf32>
    %25 = arith.addf %22, %24 : vector<24x64xf32>
    %26 = arith.truncf %25 : vector<24x64xf32> to vector<24x64xbf16>
    %c0_22 = arith.constant 0 : index
    %c0_23 = arith.constant 0 : index
    %c0_24 = arith.constant 0 : index
    %27 = vector.load %arg11[%c0_22, %c0_23, %c0_24] : memref<1x24x64xbf16, #tpu.memory_space<vmem>>, vector<1x24x64xbf16>
    %28 = vector.shape_cast %27 : vector<1x24x64xbf16> to vector<24x64xbf16>
    %29 = vector.shape_cast %26 : vector<24x64xbf16> to vector<1x24x64xbf16>
    tpu.vector_store %arg11[%c0_22, %c0_23, %c0_24], %29 {strides = array<i32>} : memref<1x24x64xbf16, #tpu.memory_space<vmem>>, vector<1x24x64xbf16>,
    return
  }
  func.func @transform_0(%arg0: i32, %arg1: i32) -> (i32, i32, i32) {
    %c0_i32 = arith.constant 0 : i32
    %c0_i32_0 = arith.constant 0 : i32
    return %arg0, %c0_i32, %arg1 : i32, i32, i32
  }
  func.func @transform_1(%arg0: i32, %arg1: i32) -> (i32, i32) {
    %c0_i32 = arith.constant 0 : i32
    %c0_i32_0 = arith.constant 0 : i32
    %c0_i32_1 = arith.constant 0 : i32
    return %c0_i32, %c0_i32_0 : i32, i32
  }
  func.func @transform_2(%arg0: i32, %arg1: i32) -> (i32, i32) {
    %c0_i32 = arith.constant 0 : i32
    %c0_i32_0 = arith.constant 0 : i32
    %c0_i32_1 = arith.constant 0 : i32
    return %c0_i32, %c0_i32_0 : i32, i32
  }
  func.func @transform_3(%arg0: i32, %arg1: i32) -> (i32, i32) {
    %c0_i32 = arith.constant 0 : i32
    %c0_i32_0 = arith.constant 0 : i32
    %c0_i32_1 = arith.constant 0 : i32
    return %c0_i32, %c0_i32_0 : i32, i32
  }
  func.func @transform_4(%arg0: i32, %arg1: i32) -> (i32, i32) {
    %c0_i32 = arith.constant 0 : i32
    %c0_i32_0 = arith.constant 0 : i32
    %c0_i32_1 = arith.constant 0 : i32
    return %c0_i32, %c0_i32_0 : i32, i32
  }
  func.func @transform_5(%arg0: i32, %arg1: i32) -> (i32, i32) {
    %c0_i32 = arith.constant 0 : i32
    %c0_i32_0 = arith.constant 0 : i32
    %c0_i32_1 = arith.constant 0 : i32
    return %c0_i32, %c0_i32_0 : i32, i32
  }
  func.func @transform_6(%arg0: i32, %arg1: i32) -> (i32, i32) {
    %c0_i32 = arith.constant 0 : i32
    %c0_i32_0 = arith.constant 0 : i32
    %c0_i32_1 = arith.constant 0 : i32
    return %c0_i32, %c0_i32_0 : i32, i32
  }
  func.func @transform_7(%arg0: i32, %arg1: i32) -> (i32, i32, i32) {
    %c0_i32 = arith.constant 0 : i32
    %c0_i32_0 = arith.constant 0 : i32
    return %arg0, %c0_i32, %arg1 : i32, i32, i32
  }
  func.func @transform_8(%arg0: i32, %arg1: i32) -> (i32, i32, i32) {
    %c0_i32 = arith.constant 0 : i32
    %c0_i32_0 = arith.constant 0 : i32
    return %arg0, %c0_i32, %arg1 : i32, i32, i32
  }
  func.func @transform_9(%arg0: i32, %arg1: i32) -> (i32, i32, i32) {
    %c0_i32 = arith.constant 0 : i32
    %c0_i32_0 = arith.constant 0 : i32
    return %arg0, %c0_i32, %arg1 : i32, i32, i32
  }
}

</mosaic_0001>

<bundles_post_ra>
// kernel: tpu_custom_call.1
= control target key start
LH: loop header
LB: loop body
LE: loop exit
PB: predicated region body
PF: predicated region fallthrough
CT: control target
= control target key end

     0   :  { %s1307_s0 = inlined_call_operand.vmem [shape: f32[2,16,64], index: 0, kind: input, shape index: {}]   ;;  %s1308_s1 = inlined_call_operand.vmem [shape: bf16[2,16], index: 1, kind: input, shape index: {}]   ;;  %s1309_s2 = inlined_call_operand.vmem [shape: f32[2,1], index: 2, kind: input, shape index: {}]   ;;  %s1310_s3 = inlined_call_operand.vmem [shape: bf16[2,16], index: 3, kind: input, shape index: {}]   ;;  %s1311_s4 = inlined_call_operand.vmem [shape: f32[2,1], index: 4, kind: input, shape index: {}]   ;;  %s1312_s5 = inlined_call_operand.vmem [shape: bf16[24,16], index: 5, kind: input, shape index: {}]   ;;  %s1313_s6 = inlined_call_operand.vmem [shape: f32[24,1], index: 6, kind: input, shape index: {}]   ;;  %s1314_s7 = inlined_call_operand.hbm [shape: bf16[2,2,64], index: 7, kind: output, shape index: {0}]   ;;  %s1315_s8 = inlined_call_operand.hbm [shape: bf16[2,2,64], index: 8, kind: output, shape index: {1}]   ;;  %s1316_s9 = inlined_call_operand.hbm [shape: bf16[2,24,64], index: 9, kind: output, shape index: {2}]  }
   0x1   :  { %1318 = sst [smem:[#allocation9_spill]] %s1307_s0 }
   0x2   :  { %1319 = sst [smem:[#allocation10_spill]] %s1308_s1 }
   0x3   :  { %1320 = sst [smem:[#allocation11_spill]] %s1309_s2 }
   0x4   :  { %1321 = sst [smem:[#allocation12_spill]] %s1310_s3 }
   0x5   :  { %1322 = sst [smem:[#allocation13_spill]] %s1311_s4 }
   0x6   :  { %15 = vsyncpa [#allocation3], 0 }
   0x7   :  { %17 = vsyncpa [#allocation3 + $0x1], 0 }
   0x8   :  { %18 = vsyncpa [#allocation5], 0 }
   0x9   :  { %20 = vsyncpa [#allocation5 + $0x1], 0  ;;  %s1088_s30 = smov 0   ;;  %s1090_s10 = smov 0  }
   0xa   :  { %s1092_s11 = smov 0   ;;  %s1094_s12 = smov 0  }
   0xb   :  { %s1096_s13 = smov 0   ;;  %s1098_s14 = smov 0  }
   0xc LB: > { %s770_s15 = sadd.s32 4294967295, %s1028_s14   ;;  %s1317_s16 = sadd.s32 4294967294, %s1028_s14   ;;  %s1028_s14 = sphi %s1098_s14, %s26_s14   ;;  %s1024_s13 = sphi %s1096_s13, %s1336_s13   ;;  %s1020_s12 = sphi %s1094_s12, %s1335_s12   ;;  %s1016_s11 = sphi %s1092_s11, %s1334_s11   ;;  %s1012_s10 = sphi %s1090_s10, %s1333_s10   ;;  %s1008_s30 = sphi %s1088_s30, %s1332_s30  }
   0xd   : > { %s38_s17 = sadd.s32 1, %s1024_s13  ;;  %s201_s18 = sadd.s32 1, %s1016_s11 }
   0xe   : > { %p40_p0 = scmp.ge.s32.totalorder %s38_s17, 2  ;;  %p211_p1 = scmp.ne.s32.totalorder %s1016_s11, %s1012_s10 }
   0xf   : > { %p212_p2 = scmp.eq.s32.totalorder %s770_s15, 1  ;;  %p217_p3 = scmp.ne.s32.totalorder %s1012_s10, %s1008_s30 }
  0x10   : > { %s1338_s17 = smov (%p40_p0, %s38_s17), 0  ;;  %p218_p5 = scmp.eq.s32.totalorder %s1317_s16, 1 }
  0x11   : > { %p1130_p4 = por %p212_p2, %p211_p1  ;;  %s196_s20 = ssub.s32 %s1024_s13, %s1338_s17 }
  0x12   : > { %p774_p6 = scmp.ge.s32.totalorder %s1028_s14, 1  ;;  %p199_p7 = scmp.eq.s32.totalorder %s196_s20, 0 }
  0x13   : > { %p1139_p8 = por %p218_p5, %p217_p3  ;;  %p321_p9 = scmp.lt.s32.totalorder %s1028_s14, 3 }
  0x14   : > { %s1145_s22 = scalar_select %p199_p7, %s1016_s11, %s201_s18  }
  0x15   : > { %p322_p10 = pnand %p774_p6, %p321_p9 }
  0x16   : > { %p368_p11 = scmp.lt.s32.totalorder (!%p322_p10), %s1020_s12, 1  ;;  %s1325_s4 = sld [smem:[#allocation13_spill]] (!%p322_p10) }
  0x17   : > { %325 = sbr.rel (%p322_p10) target bundleno = 297 (0x129), region = 48  ;;  %s1326_s0 = sld [smem:[#allocation9_spill]] (!%p322_p10) }
  0x18   : > { %s1327_s2 = sld [smem:[#allocation11_spill]] (!%p322_p10)  ;;  %s1184_s27 = sand.u32 (!%p322_p10), 1, %s770_s15  }
  0x19   : > { %s1328_s1 = sld [smem:[#allocation10_spill]] (!%p322_p10)  ;;  %s591_s25 = scalar_lea.sflag (!%p322_p10), [#allocation5], %s1184_s27 }
  0x1a   : > { %s1329_s3 = sld [smem:[#allocation12_spill]] (!%p322_p10) }
  0x1c   : > { %v1030_v0 = vmov 0.0   ;;  %vm1031_vm0 = vmmov 0   ;;  %s369_s23 = scalar_select %p368_p11, %s1020_s12, 1  ;;  %v435_v1 = vld [vmem:[%s1325_s4] sm:$0x3]  ;;  %v1032_v3 = vmov 0  }
  0x1d   : > { %802 = vmatprep.subr.bf16.mxu0 %v1030_v0  ;;  %804 = vmatprep.mubr.msk.bf16.mxu0 %vm1031_vm0, %v1030_v0  ;;  %v489_v2 = vld [vmem:[%s1313_s6] sm:$0xff]  ;;  %v490_v8 = vld [vmem:[%s1313_s6 + $0x8] sm:$0xff]  ;;  %vm387_vm1 = vcmask 130048   ;;  %v491_v12 = vld [vmem:[%s1313_s6 + $0x10] sm:$0xff]  ;;  %vm432_vm2 = vcmask 516096  }
  0x1e   : > { %808 = vmatprep.subr.bf16.mxu1 %v1030_v0  ;;  %810 = vmatprep.mubr.msk.bf16.mxu1 %vm1031_vm0, %v1030_v0  ;;  %s791_s28 = sshll.u32 %s369_s23, 4  ;;  %v381_v7 = vld [vmem:[%s1327_s2] sm:$0x3]  ;;  %v895_v13 = vld [vmem:[%s1312_s5 + $0x8] ss:$0 sps:$4 sm:$0xff]   ;;  %s1180_s23 = sand.u32 1, %s1012_s10  }
  0x1f   : > { %892 = vset.pattern.permute.xlu0 %v1032_v3  ;;  %893 = vset.pattern.permute.xlu1 %v1032_v3  ;;  %s375_s20 = scalar_lea.vmem %s1326_s0, %s791_s28  ;;  %v380_v9 = vld [vmem:[%s1328_s1] sm:$0x1]  ;;  %s786_s28 = sshll.u32 %s1020_s12, 4 }
  0x20   : > { %438 = vperm.xlu0 %892, %v435_v1   ;;  %494 = vperm.xlu1 %893, %v489_v2   ;;  %v377_v4 = vld [vmem:[%s375_s20] sm:$0xff]  ;;  %v378_v5 = vld [vmem:[%s375_s20 + $0x8] sm:$0xff]  ;;  %s360_s29 = scalar_lea.vmem [#allocation4], %s1180_s23  ;;  %s354_s20 = scalar_lea.vmem [#allocation2], %s1180_s23 }
  0x21   : > { %v379_v6 = vpack.c.bf16 %v378_v5, %v377_v4  ;;  %v434_v10 = vld [vmem:[%s1329_s3] sm:$0x1]  ;;  %s623_s18 = sshll.u32 %s360_s29, 4  ;;  %s609_s16 = sshll.u32 %s354_s20, 4  ;;  %s1194_s18 = int_to_ptr.vmem [resolvable:$true] %s623_s18  ;;  %s1201_s16 = int_to_ptr.vmem [resolvable:$true] %s609_s16 }
  0x22   : > { %v894_v11 = vld [vmem:[%s1312_s5] sm:$0xff]   ;;  %s1192_s26 = scalar_lea.hbm %s1315_s8, %s786_s28  ;;  %s1199_s1 = scalar_lea.hbm %s1314_s7, %s786_s28 }
  0x23   : > { %803 = vmatpush3.bf16.msra.mxu0 %v379_v6  ;;  %809 = vmatpush3.bf16.msra.mxu1 %v379_v6  ;;  %s896_s2 = scalar_lea.vmem %s1194_s18, 16  ;;  %s1033_s3 = smov [#allocation4]  }
  0x24   : > { %814 = vmatprep.subr.bf16.mxu0 %v379_v6  ;;  %384 = vperm.xlu0 %892, %v381_v7   ;;  %p897_p12 = scmp.ne.s32.totalorder %s1194_s18, %s896_s2  ;;  %s900_s4 = sshll.u32 %s1033_s3, 4  ;;  %s901_s4 = int_to_ptr.vmem [resolvable:$false] %s900_s4 }
  0x25   : > { %499 = vperm.xlu1 %893, %v490_v8   ;;  %s902_s0 = scalar_lea.vmem %s901_s4, 32  ;;  %p903_p1 = scmp.lt.s32.totalorder %s1194_s18, %s901_s4 }
  0x26   : > { %805 = vmatmul.mubr.msk.bf16.vlgmr.msra.gmra.mxu0 %vm387_vm1, %v380_v9  ;;  %811 = vmatmul.mubr.msk.bf16.vlgmr.msra.gmra.mxu1 %vm387_vm1, %v434_v10  ;;  %p898_p13 = pnand %p897_p12, %p1130_p4  ;;  %p904_p2 = scmp.lt.s32.totalorder %s902_s0, %s896_s2 }
  0x27   : > { %815 = vmatpush3.bf16.msra.mxu0 %v379_v6  ;;  %816 = vmatprep.mubr.msk.bf16.mxu0 %vm387_vm1, %v894_v11 }
  0x28   : > { %504 = vperm.xlu0 %892, %v491_v12   ;;  %p899_p0 = pneg %p898_p13  ;;  %p905_p3 = por %p904_p2, %p903_p1 }
  0x2a   : > { %p906_p5 = pnand %p905_p3, %p899_p0 }
  0x2e   : > { %817 = vmatmul.mubr.msk.bf16.vlgmr.msra.gmra.mxu0 %vm387_vm1, %v895_v13 }
  0x9b   : > { %v439_v14 = vpop.permute.xlu0 %438 }
  0x9f   : > { %v385_v15 = vpop.permute.xlu0 %384 }
  0xe6   : > { %v425_v16 = vpop.f32.mrf.mxu0  ;;  %v478_v17 = vpop.f32.mrf.mxu1 }
  0xe7   : > { %v426_v18 = vadd.f32 %v425_v16, %v385_v15  ;;  %v479_v19 = vadd.f32 %v478_v17, %v439_v14 }
  0xe8   : > { %v806_v20 = vpop.f32.mrf.mxu0  ;;  %v812_v21 = vpop.f32.mrf.mxu1 }
  0xe9   : > { %v431_v22 = vpack.c.bf16 %v426_v18, %v426_v18  ;;  %v484_v23 = vpack.c.bf16 %v479_v19, %v479_v19 }
  0xea   : > { %v428_v24 = vpop.f32.mrf.mxu0  ;;  %v481_v25 = vpop.f32.mrf.mxu1 }
  0xeb   : > { %485 = vst.msk [vmem:[%s360_s29] sm:$0x1] %vm432_vm2, %v484_v23  ;;  %433 = vst.msk [vmem:[%s354_s20] sm:$0x1] %vm432_vm2, %v431_v22 }
  0xec   : > { %v807_v26 = vpop.f32.mrf.mxu0  ;;  %v813_v27 = vpop.f32.mrf.mxu1 }
  0xed   : > { %909 = shalt.err (!%p906_p5)
}
  0xee   : > { %s910_s28 = scalar_lea.hbm %s1192_s26, 16  ;;  %s914_s3 = scalar_lea.hbm %s1315_s8, 32 }
  0xef   : > { %p911_p6 = scmp.ne.s32.totalorder %s1192_s26, %s910_s28  ;;  %p915_p10 = scmp.lt.s32.totalorder %s1192_s26, %s1315_s8 }
  0xf0   : > { %p916_p11 = scmp.lt.s32.totalorder %s914_s3, %s910_s28 }
  0xf1   : > { %p912_p7 = pnand %p911_p6, %p1130_p4 }
  0xf2   : > { %p917_p12 = por %p916_p11, %p915_p10 }
  0xf3   : > { %p913_p9 = pneg %p912_p7 }
  0xf5   : > { %p918_p13 = pnand %p917_p12, %p913_p9 }
  0xf7   : > { %921 = shalt.err (!%p918_p13)
}
  0xf8   : > { %823 = dma.vmem_to_hbm [thread:$0]  (%p1130_p4), %s1194_s18, 16, %s1192_s26, %s591_s25   ;;  %v495_v28 = vpop.permute.xlu1 %494 }
  0xf9   : > { %s587_s2 = scalar_lea.sflag [#allocation3], %s1180_s23  ;;  %s922_s4 = scalar_lea.vmem %s1201_s16, 16 }
  0xfa   : > { %p923_p0 = scmp.ne.s32.totalorder %s1201_s16, %s922_s4  ;;  %s1034_s24 = smov [#allocation2]  }
  0xfb   : > { %s926_s0 = sshll.u32 %s1034_s24, 4  ;;  %s927_s0 = int_to_ptr.vmem [resolvable:$false] %s926_s0 }
  0xfc   : > { %p924_p1 = pnand %p923_p0, %p1130_p4  ;;  %s928_s28 = scalar_lea.vmem %s927_s0, 32 }
  0xfd   : > { %p929_p3 = scmp.lt.s32.totalorder %s1201_s16, %s927_s0  ;;  %p930_p5 = scmp.lt.s32.totalorder %s928_s28, %s922_s4 }
  0xfe   : > { %p925_p2 = pneg %p924_p1 }
  0xff   : > { %p931_p6 = por %p930_p5, %p929_p3 }
 0x101   : > { %p932_p7 = pnand %p931_p6, %p925_p2 }
 0x103   : > { %935 = shalt.err (!%p932_p7)
}
 0x104   : > { %s936_s18 = scalar_lea.hbm %s1199_s1, 16  ;;  %s940_s20 = scalar_lea.hbm %s1314_s7, 32 }
 0x105   : > { %p937_p9 = scmp.ne.s32.totalorder %s1199_s1, %s936_s18  ;;  %p941_p12 = scmp.lt.s32.totalorder %s1199_s1, %s1314_s7 }
 0x106   : > { %p942_p13 = scmp.lt.s32.totalorder %s940_s20, %s936_s18 }
 0x107   : > { %p938_p10 = pnand %p937_p9, %p1130_p4 }
 0x108   : > { %p943_p0 = por %p942_p13, %p941_p12 }
 0x109   : > { %p939_p11 = pneg %p938_p10 }
 0x10b   : > { %p944_p1 = pnand %p943_p0, %p939_p11 }
 0x10d   : > { %947 = shalt.err (!%p944_p1)
}
 0x10e   : > { %822 = dma.vmem_to_hbm [thread:$0]  (%p1130_p4), %s1201_s16, 16, %s1199_s1, %s587_s2   ;;  %v505_v29 = vpop.permute.xlu0 %504  ;;  %v818_v30 = vpop.f32.mrf.mxu0  ;;  %vm582_vm3 = vcmask 519168  }
 0x10f   : > { %v564_v31 = vadd.f32 %v818_v30, %v505_v29  ;;  %s1330_s4 = smul.u32 12, %s1180_s23  ;;  %v500_v37 = vpop.permute.xlu1 %499 }
 0x110   : > { %v555_v32 = vpop.f32.mrf.mxu0  ;;  %s821_s28 = smul.u32 192, %s1020_s12  ;;  %s1035_s12 = smov [#allocation6]  }
 0x111   : > { %v794_v33 = vpack.c.bf16 %v564_v31, %v564_v31  ;;  %v556_v34 = vadd.f32 %v555_v32, %v495_v28  ;;  %s367_s24 = scalar_lea.vmem [#allocation6], %s1330_s4  ;;  %s952_s18 = sshll.u32 %s1035_s12, 4  ;;  %s953_s18 = int_to_ptr.vmem [resolvable:$false] %s952_s18 }
 0x112   : > { %v819_v35 = vpop.f32.mrf.mxu0  ;;  %s637_s0 = sshll.u32 %s367_s24, 4  ;;  %s1258_s16 = scalar_lea.hbm %s1316_s9, %s821_s28  ;;  %s1253_s0 = int_to_ptr.vmem [resolvable:$true] %s637_s0 }
 0x113   : > { %585 = vst.msk [vmem:[%s367_s24 + $0x8] sm:$0xf] %vm582_vm3, %v794_v33  ;;  %v792_v36 = vpack.c.bf16 %v556_v34, %v556_v34  ;;  %s948_s2 = scalar_lea.vmem %s1253_s0, 192  ;;  %s954_s26 = scalar_lea.vmem %s953_s18, 384 }
 0x114   : > { %v558_v38 = vpop.f32.mrf.mxu0  ;;  %p949_p2 = scmp.ne.s32.totalorder %s1253_s0, %s948_s2  ;;  %p955_p6 = scmp.lt.s32.totalorder %s1253_s0, %s953_s18 }
 0x115   : > { %583 = vst.msk [vmem:[%s367_s24] sm:$0xf] %vm582_vm3, %v792_v36  ;;  %v559_v39 = vadd.f32 %v558_v38, %v500_v37  ;;  %p956_p7 = scmp.lt.s32.totalorder %s954_s26, %s948_s2 }
 0x116   : > { %p950_p3 = pnand %p949_p2, %p1130_p4 }
 0x117   : > { %v793_v40 = vpack.c.bf16 %v559_v39, %v559_v39  ;;  %p957_p9 = por %p956_p7, %p955_p6 }
 0x118   : > { %p951_p5 = pneg %p950_p3 }
 0x119   : > { %584 = vst.msk [vmem:[%s367_s24 + $0x4] sm:$0xf] %vm582_vm3, %v793_v40 }
 0x11a   : > { %p958_p10 = pnand %p957_p9, %p951_p5 }
 0x11c   : > { %961 = shalt.err (!%p958_p10)
}
 0x11d   : > { %s962_s29 = scalar_lea.hbm %s1258_s16, 192  ;;  %s966_s15 = scalar_lea.hbm %s1316_s9, 384 }
 0x11e   : > { %p963_p11 = scmp.ne.s32.totalorder %s1258_s16, %s962_s29  ;;  %p967_p0 = scmp.lt.s32.totalorder %s1258_s16, %s1316_s9 }
 0x11f   : > { %p968_p1 = scmp.lt.s32.totalorder %s966_s15, %s962_s29 }
 0x120   : > { %p964_p12 = pnand %p963_p11, %p1130_p4 }
 0x121   : > { %p969_p2 = por %p968_p1, %p967_p0 }
 0x122   : > { %p965_p13 = pneg %p964_p12 }
 0x124   : > { %p970_p3 = pnand %p969_p2, %p965_p13 }
 0x126   : > { %973 = shalt.err (!%p970_p3)
}
 0x127   : > { %s1036_s28 = smov 64   ;;  %s1037_s1 = smov 4  }
 0x128   : > { %824 = dma.vmem_to_hbm [thread:$0]  (%p1130_p4), %s1253_s0, 192, %s1258_s16, %s591_s25, %s1036_s28, %s1036_s28, %s1037_s1  }
 0x129 PF: > { %p838_p5 = scmp.ge.s32.totalorder %s1028_s14, 2  ;;  %s652_s23 = sand.u32 1, %s1008_s30  }
 0x12a   : > { %s653_s2 = scalar_lea.sflag [#allocation3], %s652_s23 }
 0x12b   : > { %p829_p6 = pnand %p838_p5, %p1139_p8 }
 0x12d   : > { %p830_p7 = pneg %p829_p6 }
 0x12f   : > { %999 = dma.done.wait (%p830_p7), %s653_s2, 16  }
 0x130   : > { %1001 = vsyncadd (%p830_p7), %s653_s2, 4294967280  ;;  %s1331_s12 = sadd.s32 4294967294, %s1028_s14  }
 0x131   : > { %s660_s18 = sand.u32 1, %s1331_s12  }
 0x132   : > { %s661_s26 = scalar_lea.sflag [#allocation5], %s660_s18 }
 0x133   : > { %1003 = dma.done.wait (%p830_p7), %s661_s26, 208  }
 0x134   : > { %1005 = vsyncadd (%p830_p7), %s661_s26, 4294967088  ;;  %s26_s14 = sadd.s32 1, %s1028_s14   ;;  %s1332_s30 = smov %s1012_s10 }
 0x135   : > { %p23_p4 = scmp.ge.s32.totalorder %s26_s14, 4   ;;  %s1333_s10 = smov %s1016_s11 }
 0x136   : > { %s1334_s11 = smov %s1145_s22  ;;  %s1335_s12 = smov %s1024_s13 }
 0x137   : > { %s1336_s13 = smov %s1338_s17  ;;  %25 = sbr.rel (!%p23_p4) target bundleno = 12 (0xc), region = 115 }
 0x13c   :  { %674 = vsyncpa [#allocation3], 1 }
 0x13d   :  { %676 = vsyncpa [#allocation3 + $0x1], 1 }
 0x13e   :  { %677 = vsyncpa [#allocation5], 1 }
 0x13f   :  { %679 = vsyncpa [#allocation5 + $0x1], 1 }

</bundles_post_ra>
